<compile_context>
chip_gen: v6e
topology: v6e:2x2x1
jax: 0.10.0
libtpu: 0.0.40
codegen_flags: <defaults>
</compile_context>

<pallas_src>
import functools

import jax
import jax.numpy as jnp
from jax import lax
from jax.experimental import pallas as pl
from jax.experimental.pallas import tpu as pltpu

# ogb.utils.features.get_bond_feature_dims() == [5, 6, 2]
BOND_FEATURE_DIMS = (5, 6, 2)
_NUM_BOND_COMBOS = BOND_FEATURE_DIMS[0] * BOND_FEATURE_DIMS[1] * BOND_FEATURE_DIMS[2]  # 60
_MAX_TILE_GROUPS = 1024     # groups per grid step (1024 * G = 4096 edges at D=32)
_MIN_TILE_GROUPS = 8        # sublane granularity


def _round_up(x, m):
    return ((x + m - 1) // m) * m


def _masked_bond_kernel(idx_ref, table_ref, out_ref, *, kp, g_pack, nb, d1, d2):
    """One fused gather-as-matmul per tile.

    idx_ref:   [TG, 4*G] int32 packed (ea0, ea1, ea2, mask) per edge,
               G edges per group row.
    table_ref: [G*Kp, G*D] f32 block-diagonal combined embedding table
               (rows 0..nb-1 = bond outer-sum, rows nb.. = real_emb, rest 0).
    out_ref:   [TG, G*D] f32 — G edges packed per 128-lane output row.
    """
    tg = out_ref.shape[0]
    kd = table_ref.shape[0]                       # G * Kp (contraction dim)
    iota = lax.broadcasted_iota(jnp.int32, (tg, kd), 1)

    # One column index per edge: the masked select is folded into the index.
    # Hits of different in-group edges land in disjoint Kp-blocks, so OR of
    # the per-slot one-hots is exact.
    hit = None
    for g in range(g_pack):
        ea0 = idx_ref[:, 4 * g + 0:4 * g + 1]     # [TG, 1]
        ea1 = idx_ref[:, 4 * g + 1:4 * g + 2]
        ea2 = idx_ref[:, 4 * g + 2:4 * g + 3]
        m = idx_ref[:, 4 * g + 3:4 * g + 4]
        bond_col = ea0 * (d1 * d2) + ea1 * d2 + ea2       # combined bond row
        col = jnp.where(m == 0, bond_col, nb + m)         # fake -> real_emb row
        # Clamp inside this edge's Kp-block so bad inputs can never select a
        # row belonging to another packed edge.
        col = jnp.minimum(jnp.maximum(col, 0), kp - 1) + g * kp
        h = iota == col
        hit = h if hit is None else jnp.logical_or(hit, h)

    onehot = hit.astype(jnp.float32)              # exact 0/1 gather matrix
    # Single MXU matmul does: table lookup, masked select, and lane packing.
    out_ref[...] = jnp.dot(onehot, table_ref[...],
                           preferred_element_type=jnp.float32)


def build_masked_bond_table(emb0, emb1, emb2, real_emb, *, emb_dim):
    """Combined block-diagonal table. Cache this across calls — the
    embeddings are parameters and the table only changes when they do."""
    D = emb_dim
    nh = real_emb.shape[0]
    G = 128 // D if (D <= 128 and 128 % D == 0) else 1
    Kp = max(_round_up(_NUM_BOND_COMBOS + nh, 8), 8)

    # Outer-sum of the three bond tables: row i*12 + j*2 + k = e0[i]+e1[j]+e2[k].
    bond_sum = (emb0[:, None, None, :].astype(jnp.float32)
                + emb1[None, :, None, :].astype(jnp.float32)
                + emb2[None, None, :, :].astype(jnp.float32)
                ).reshape(_NUM_BOND_COMBOS, D)
    concat = jnp.zeros((Kp, D), jnp.float32)
    concat = concat.at[:_NUM_BOND_COMBOS].set(bond_sum)
    concat = concat.at[_NUM_BOND_COMBOS:_NUM_BOND_COMBOS + nh].set(
        real_emb.astype(jnp.float32))
    # Block-diagonal replication so G edges land in disjoint 128/G-lane blocks.
    table = jnp.kron(jnp.eye(G, dtype=jnp.float32), concat)     # [G*Kp, G*D]
    return table, G, Kp


def masked_bond_encoder(edge_attr, real_edge_mask, emb0, emb1, emb2, real_emb):
    """edge_attr: [E, 3] int; real_edge_mask: [E] int; returns [E, D] f32."""
    E = edge_attr.shape[0]
    D = emb0.shape[1]
    _, d1, d2 = BOND_FEATURE_DIMS

    # TODO(synk): hoist/cache this table build out of the per-call path when
    # the embedding parameters are reused across many calls.
    table, G, Kp = build_masked_bond_table(emb0, emb1, emb2, real_emb, emb_dim=D)

    # Pack (ea0, ea1, ea2, mask) -> one [E, 4] int32 input (single DMA);
    # all index arithmetic happens inside the kernel.
    idx = jnp.concatenate(
        [edge_attr.astype(jnp.int32),
         real_edge_mask.astype(jnp.int32)[:, None]], axis=1)     # [E, 4]

    # Divisor-aware tile selection; keep >= 2 grid steps when there is enough
    # work so v7x's two TensorCores both get a share of the grid.
    groups = pl.cdiv(E, G)
    num_steps = pl.cdiv(groups, _MAX_TILE_GROUPS)
    if groups >= 2 * _MIN_TILE_GROUPS:
        num_steps = max(num_steps, 2)
    tile_g = _round_up(pl.cdiv(groups, num_steps), _MIN_TILE_GROUPS)
    num_steps = pl.cdiv(groups, tile_g)
    groups_pad = num_steps * tile_g
    e_pad = groups_pad * G
    if e_pad != E:
        idx = jnp.pad(idx, ((0, e_pad - E), (0, 0)))   # pad edges -> row 0 (discarded)
    idx = idx.reshape(groups_pad, 4 * G)               # free contiguous reshape

    kernel = functools.partial(_masked_bond_kernel, kp=Kp, g_pack=G,
                               nb=_NUM_BOND_COMBOS, d1=d1, d2=d2)
    out = pl.pallas_call(
        kernel,
        out_shape=jax.ShapeDtypeStruct((groups_pad, G * D), jnp.float32),
        grid_spec=pltpu.PrefetchScalarGridSpec(
            num_scalar_prefetch=0,
            grid=(num_steps,),
            in_specs=[
                pl.BlockSpec((tile_g, 4 * G), lambda i: (i, 0)),
                pl.BlockSpec((G * Kp, G * D), lambda i: (0, 0)),
            ],
            out_specs=pl.BlockSpec((tile_g, G * D), lambda i: (i, 0)),
        ),
        compiler_params=pltpu.CompilerParams(
            dimension_semantics=("parallel",)),
    )(idx, table)

    out = out.reshape(e_pad, D)   # free contiguous reshape: [r, g*D+d] -> edge r*G+g
    if e_pad != E:
        # TODO(synk): pad E upstream to a multiple of G*tile_g to avoid this slice copy.
        out = out[:E]
    return out


def _xavier_uniform(key, shape):
    fan_in, fan_out = shape
    bound = (6.0 / (fan_in + fan_out)) ** 0.5
    return jax.random.uniform(key, shape, jnp.float32, -bound, bound)


def _reference(edge_attr, mask, emb0, emb1, emb2, real_emb):
    bond = emb0[edge_attr[:, 0]] + emb1[edge_attr[:, 1]] + emb2[edge_attr[:, 2]]
    fake = real_emb[mask]
    return jnp.where((mask == 0)[:, None], bond, fake)


if __name__ == "__main__":
    emb_dim = 32
    num_hier = 4
    E = 256   # groups=64 -> 2 grid steps of 32 groups, no pad / no slice copy

    key = jax.random.PRNGKey(0)
    k0, k1, k2, k3, k4, k5 = jax.random.split(key, 6)

    emb0 = _xavier_uniform(k0, (BOND_FEATURE_DIMS[0], emb_dim))
    emb1 = _xavier_uniform(k1, (BOND_FEATURE_DIMS[1], emb_dim))
    emb2 = _xavier_uniform(k2, (BOND_FEATURE_DIMS[2], emb_dim))
    real_emb = _xavier_uniform(k3, (num_hier, emb_dim))

    edge_attr = jnp.stack(
        [jax.random.randint(jax.random.fold_in(k4, i), (E,), 0,
                            BOND_FEATURE_DIMS[i], jnp.int32)
         for i in range(3)], axis=1)                       # [E, 3]
    real_edge_mask = jax.random.randint(k5, (E,), 0, num_hier, jnp.int32)

    out = masked_bond_encoder(edge_attr, real_edge_mask,
                              emb0, emb1, emb2, real_emb)
    out = jax.block_until_ready(out)

    ref = _reference(edge_attr, real_edge_mask, emb0, emb1, emb2, real_emb)
    assert out.shape == (E, emb_dim)
    assert jnp.allclose(out, ref, atol=1e-5, rtol=1e-5)
    print("KERNEL_OK")
</pallas_src>

<mosaic_0001>
module attributes {stable_mosaic.version = 11 : i64} {
  func.func @_masked_bond_kernel(%arg0: i32, %arg1: memref<32x16xi32, #tpu.memory_space<vmem>>, %arg2: memref<256x128xf32, #tpu.memory_space<vmem>>, %arg3: memref<32x128xf32, #tpu.memory_space<vmem>>) attributes {dimension_semantics = [#tpu.dimension_semantics<parallel>], iteration_bounds = array<i64: 2>, scalar_prefetch = 0 : i64, scratch_operands = 0 : i64, tpu.core_type = #tpu.core_type<tc>, window_params = [{transform_indices = @transform_0, window_bounds = array<i64: 32, 16>}, {pipeline_mode = #tpu.pipeline_mode<synchronous>, transform_indices = @transform_1, window_bounds = array<i64: 256, 128>}, {transform_indices = @transform_2, window_bounds = array<i64: 32, 128>}]} {
    %0 = tpu.iota {dimensions = array<i32: 1>} : vector<32x256xi32>
    %c0 = arith.constant 0 : index
    %c0_0 = arith.constant 0 : index
    %1 = vector.load %arg1[%c0, %c0_0] : memref<32x16xi32, #tpu.memory_space<vmem>>, vector<32x1xi32>
    %c0_1 = arith.constant 0 : index
    %c1 = arith.constant 1 : index
    %2 = vector.load %arg1[%c0_1, %c1] : memref<32x16xi32, #tpu.memory_space<vmem>>, vector<32x1xi32>
    %c0_2 = arith.constant 0 : index
    %c2 = arith.constant 2 : index
    %3 = vector.load %arg1[%c0_2, %c2] : memref<32x16xi32, #tpu.memory_space<vmem>>, vector<32x1xi32>
    %c0_3 = arith.constant 0 : index
    %c3 = arith.constant 3 : index
    %4 = vector.load %arg1[%c0_3, %c3] : memref<32x16xi32, #tpu.memory_space<vmem>>, vector<32x1xi32>
    %c12_i32 = arith.constant 12 : i32
    %5 = vector.broadcast %c12_i32 : i32 to vector<32x1xi32>
    %6 = arith.muli %1, %5 : vector<32x1xi32>
    %c2_i32 = arith.constant 2 : i32
    %7 = vector.broadcast %c2_i32 : i32 to vector<32x1xi32>
    %8 = arith.muli %2, %7 : vector<32x1xi32>
    %9 = arith.addi %6, %8 : vector<32x1xi32>
    %10 = arith.addi %9, %3 : vector<32x1xi32>
    %c0_i32 = arith.constant 0 : i32
    %11 = vector.broadcast %c0_i32 : i32 to vector<32x1xi32>
    %12 = arith.cmpi eq, %4, %11 : vector<32x1xi32>
    %c60_i32 = arith.constant 60 : i32
    %13 = vector.broadcast %c60_i32 : i32 to vector<32x1xi32>
    %14 = arith.addi %13, %4 : vector<32x1xi32>
    %15 = arith.select %12, %10, %14 : vector<32x1xi1>, vector<32x1xi32>
    %c0_i32_4 = arith.constant 0 : i32
    %16 = vector.broadcast %c0_i32_4 : i32 to vector<32x1xi32>
    %17 = arith.maxsi %15, %16 : vector<32x1xi32>
    %c63_i32 = arith.constant 63 : i32
    %18 = vector.broadcast %c63_i32 : i32 to vector<32x1xi32>
    %19 = arith.minsi %17, %18 : vector<32x1xi32>
    %c0_i32_5 = arith.constant 0 : i32
    %20 = vector.broadcast %c0_i32_5 : i32 to vector<32x1xi32>
    %21 = arith.addi %19, %20 : vector<32x1xi32>
    %22 = vector.broadcast %21 : vector<32x1xi32> to vector<32x256xi32>
    %23 = arith.cmpi eq, %0, %22 : vector<32x256xi32>
    %c0_6 = arith.constant 0 : index
    %c4 = arith.constant 4 : index
    %24 = vector.load %arg1[%c0_6, %c4] : memref<32x16xi32, #tpu.memory_space<vmem>>, vector<32x1xi32>
    %c0_7 = arith.constant 0 : index
    %c5 = arith.constant 5 : index
    %25 = vector.load %arg1[%c0_7, %c5] : memref<32x16xi32, #tpu.memory_space<vmem>>, vector<32x1xi32>
    %c0_8 = arith.constant 0 : index
    %c6 = arith.constant 6 : index
    %26 = vector.load %arg1[%c0_8, %c6] : memref<32x16xi32, #tpu.memory_space<vmem>>, vector<32x1xi32>
    %c0_9 = arith.constant 0 : index
    %c7 = arith.constant 7 : index
    %27 = vector.load %arg1[%c0_9, %c7] : memref<32x16xi32, #tpu.memory_space<vmem>>, vector<32x1xi32>
    %c12_i32_10 = arith.constant 12 : i32
    %28 = vector.broadcast %c12_i32_10 : i32 to vector<32x1xi32>
    %29 = arith.muli %24, %28 : vector<32x1xi32>
    %c2_i32_11 = arith.constant 2 : i32
    %30 = vector.broadcast %c2_i32_11 : i32 to vector<32x1xi32>
    %31 = arith.muli %25, %30 : vector<32x1xi32>
    %32 = arith.addi %29, %31 : vector<32x1xi32>
    %33 = arith.addi %32, %26 : vector<32x1xi32>
    %c0_i32_12 = arith.constant 0 : i32
    %34 = vector.broadcast %c0_i32_12 : i32 to vector<32x1xi32>
    %35 = arith.cmpi eq, %27, %34 : vector<32x1xi32>
    %c60_i32_13 = arith.constant 60 : i32
    %36 = vector.broadcast %c60_i32_13 : i32 to vector<32x1xi32>
    %37 = arith.addi %36, %27 : vector<32x1xi32>
    %38 = arith.select %35, %33, %37 : vector<32x1xi1>, vector<32x1xi32>
    %c0_i32_14 = arith.constant 0 : i32
    %39 = vector.broadcast %c0_i32_14 : i32 to vector<32x1xi32>
    %40 = arith.maxsi %38, %39 : vector<32x1xi32>
    %c63_i32_15 = arith.constant 63 : i32
    %41 = vector.broadcast %c63_i32_15 : i32 to vector<32x1xi32>
    %42 = arith.minsi %40, %41 : vector<32x1xi32>
    %c64_i32 = arith.constant 64 : i32
    %43 = vector.broadcast %c64_i32 : i32 to vector<32x1xi32>
    %44 = arith.addi %42, %43 : vector<32x1xi32>
    %45 = vector.broadcast %44 : vector<32x1xi32> to vector<32x256xi32>
    %46 = arith.cmpi eq, %0, %45 : vector<32x256xi32>
    %47 = arith.ori %23, %46 : vector<32x256xi1>
    %c0_16 = arith.constant 0 : index
    %c8 = arith.constant 8 : index
    %48 = vector.load %arg1[%c0_16, %c8] : memref<32x16xi32, #tpu.memory_space<vmem>>, vector<32x1xi32>
    %c0_17 = arith.constant 0 : index
    %c9 = arith.constant 9 : index
    %49 = vector.load %arg1[%c0_17, %c9] : memref<32x16xi32, #tpu.memory_space<vmem>>, vector<32x1xi32>
    %c0_18 = arith.constant 0 : index
    %c10 = arith.constant 10 : index
    %50 = vector.load %arg1[%c0_18, %c10] : memref<32x16xi32, #tpu.memory_space<vmem>>, vector<32x1xi32>
    %c0_19 = arith.constant 0 : index
    %c11 = arith.constant 11 : index
    %51 = vector.load %arg1[%c0_19, %c11] : memref<32x16xi32, #tpu.memory_space<vmem>>, vector<32x1xi32>
    %c12_i32_20 = arith.constant 12 : i32
    %52 = vector.broadcast %c12_i32_20 : i32 to vector<32x1xi32>
    %53 = arith.muli %48, %52 : vector<32x1xi32>
    %c2_i32_21 = arith.constant 2 : i32
    %54 = vector.broadcast %c2_i32_21 : i32 to vector<32x1xi32>
    %55 = arith.muli %49, %54 : vector<32x1xi32>
    %56 = arith.addi %53, %55 : vector<32x1xi32>
    %57 = arith.addi %56, %50 : vector<32x1xi32>
    %c0_i32_22 = arith.constant 0 : i32
    %58 = vector.broadcast %c0_i32_22 : i32 to vector<32x1xi32>
    %59 = arith.cmpi eq, %51, %58 : vector<32x1xi32>
    %c60_i32_23 = arith.constant 60 : i32
    %60 = vector.broadcast %c60_i32_23 : i32 to vector<32x1xi32>
    %61 = arith.addi %60, %51 : vector<32x1xi32>
    %62 = arith.select %59, %57, %61 : vector<32x1xi1>, vector<32x1xi32>
    %c0_i32_24 = arith.constant 0 : i32
    %63 = vector.broadcast %c0_i32_24 : i32 to vector<32x1xi32>
    %64 = arith.maxsi %62, %63 : vector<32x1xi32>
    %c63_i32_25 = arith.constant 63 : i32
    %65 = vector.broadcast %c63_i32_25 : i32 to vector<32x1xi32>
    %66 = arith.minsi %64, %65 : vector<32x1xi32>
    %c128_i32 = arith.constant 128 : i32
    %67 = vector.broadcast %c128_i32 : i32 to vector<32x1xi32>
    %68 = arith.addi %66, %67 : vector<32x1xi32>
    %69 = vector.broadcast %68 : vector<32x1xi32> to vector<32x256xi32>
    %70 = arith.cmpi eq, %0, %69 : vector<32x256xi32>
    %71 = arith.ori %47, %70 : vector<32x256xi1>
    %c0_26 = arith.constant 0 : index
    %c12 = arith.constant 12 : index
    %72 = vector.load %arg1[%c0_26, %c12] : memref<32x16xi32, #tpu.memory_space<vmem>>, vector<32x1xi32>
    %c0_27 = arith.constant 0 : index
    %c13 = arith.constant 13 : index
    %73 = vector.load %arg1[%c0_27, %c13] : memref<32x16xi32, #tpu.memory_space<vmem>>, vector<32x1xi32>
    %c0_28 = arith.constant 0 : index
    %c14 = arith.constant 14 : index
    %74 = vector.load %arg1[%c0_28, %c14] : memref<32x16xi32, #tpu.memory_space<vmem>>, vector<32x1xi32>
    %c0_29 = arith.constant 0 : index
    %c15 = arith.constant 15 : index
    %75 = vector.load %arg1[%c0_29, %c15] : memref<32x16xi32, #tpu.memory_space<vmem>>, vector<32x1xi32>
    %c12_i32_30 = arith.constant 12 : i32
    %76 = vector.broadcast %c12_i32_30 : i32 to vector<32x1xi32>
    %77 = arith.muli %72, %76 : vector<32x1xi32>
    %c2_i32_31 = arith.constant 2 : i32
    %78 = vector.broadcast %c2_i32_31 : i32 to vector<32x1xi32>
    %79 = arith.muli %73, %78 : vector<32x1xi32>
    %80 = arith.addi %77, %79 : vector<32x1xi32>
    %81 = arith.addi %80, %74 : vector<32x1xi32>
    %c0_i32_32 = arith.constant 0 : i32
    %82 = vector.broadcast %c0_i32_32 : i32 to vector<32x1xi32>
    %83 = arith.cmpi eq, %75, %82 : vector<32x1xi32>
    %c60_i32_33 = arith.constant 60 : i32
    %84 = vector.broadcast %c60_i32_33 : i32 to vector<32x1xi32>
    %85 = arith.addi %84, %75 : vector<32x1xi32>
    %86 = arith.select %83, %81, %85 : vector<32x1xi1>, vector<32x1xi32>
    %c0_i32_34 = arith.constant 0 : i32
    %87 = vector.broadcast %c0_i32_34 : i32 to vector<32x1xi32>
    %88 = arith.maxsi %86, %87 : vector<32x1xi32>
    %c63_i32_35 = arith.constant 63 : i32
    %89 = vector.broadcast %c63_i32_35 : i32 to vector<32x1xi32>
    %90 = arith.minsi %88, %89 : vector<32x1xi32>
    %c192_i32 = arith.constant 192 : i32
    %91 = vector.broadcast %c192_i32 : i32 to vector<32x1xi32>
    %92 = arith.addi %90, %91 : vector<32x1xi32>
    %93 = vector.broadcast %92 : vector<32x1xi32> to vector<32x256xi32>
    %94 = arith.cmpi eq, %0, %93 : vector<32x256xi32>
    %95 = arith.ori %71, %94 : vector<32x256xi1>
    %96 = arith.extui %95 : vector<32x256xi1> to vector<32x256xi32>
    %97 = arith.sitofp %96 : vector<32x256xi32> to vector<32x256xf32>
    %c0_36 = arith.constant 0 : index
    %c0_37 = arith.constant 0 : index
    %98 = vector.load %arg2[%c0_36, %c0_37] : memref<256x128xf32, #tpu.memory_space<vmem>>, vector<256x128xf32>
    %cst = arith.constant dense<0.000000e+00> : vector<32x128xf32>
    %99 = tpu.matmul %97, %98, %cst {dimension_numbers = #tpu.dot_dimension_numbers<[1], [0], [0], [1], [0, 0, 1, 1], [], []>} : vector<32x256xf32>, vector<256x128xf32>, vector<32x128xf32> -> vector<32x128xf32>
    %c0_38 = arith.constant 0 : index
    %c0_39 = arith.constant 0 : index
    %100 = vector.load %arg3[%c0_38, %c0_39] : memref<32x128xf32, #tpu.memory_space<vmem>>, vector<32x128xf32>
    tpu.vector_store %arg3[%c0_38, %c0_39], %99 {strides = array<i32>} : memref<32x128xf32, #tpu.memory_space<vmem>>, vector<32x128xf32>,
    return
  }
  func.func @transform_0(%arg0: i32) -> (i32, i32) {
    %c0_i32 = arith.constant 0 : i32
    %c0_i32_0 = arith.constant 0 : i32
    return %arg0, %c0_i32 : i32, i32
  }
  func.func @transform_1(%arg0: i32) -> (i32, i32) {
    %c0_i32 = arith.constant 0 : i32
    %c0_i32_0 = arith.constant 0 : i32
    %c0_i32_1 = arith.constant 0 : i32
    return %c0_i32, %c0_i32_0 : i32, i32
  }
  func.func @transform_2(%arg0: i32) -> (i32, i32) {
    %c0_i32 = arith.constant 0 : i32
    %c0_i32_0 = arith.constant 0 : i32
    return %arg0, %c0_i32 : i32, i32
  }
}

</mosaic_0001>

<bundles_post_ra>
// kernel: tpu_custom_call.1
= control target key start
LH: loop header
LB: loop body
LE: loop exit
PB: predicated region body
PF: predicated region fallthrough
CT: control target
= control target key end

     0   :  { %7 = vsyncpa [#allocation3], 0  ;;  %s1098_s0 = inlined_call_operand.vmem [shape: s32[64,16], index: 0, kind: input, shape index: {}]   ;;  %s1099_s1 = inlined_call_operand.hbm [shape: f32[256,128], index: 1, kind: input, shape index: {}]   ;;  %s1100_s2 = inlined_call_operand.hbm [shape: f32[64,128], index: 2, kind: output, shape index: {}]  }
   0x1   :  { %8 = vsyncpa [#allocation4], 0 }
   0x2   :  { %10 = vsyncpa [#allocation4 + $0x1], 0  ;;  %s878_s9 = smov 0   ;;  %s880_s10 = smov 0  }
   0x3   :  { %s882_s11 = smov 0   ;;  %s884_s12 = smov 0  }
   0x4 LB: > { %s899_s13 = sadd.s32 4294967295, %s847_s12   ;;  %s576_s14 = sadd.s32 4294967294, %s847_s12   ;;  %s847_s12 = sphi %s884_s12, %s1113_s12   ;;  %s843_s11 = sphi %s882_s11, %s1112_s11   ;;  %s839_s10 = sphi %s880_s10, %s1111_s10   ;;  %s835_s9 = sphi %s878_s9, %s1110_s9  }
   0x5   : > { %s903_s15 = sadd.s32 1, %s847_s12   ;;  %s70_s16 = sadd.s32 1, %s843_s11 }
   0x6   : > { %s67_s17 = ssub.s32 %s847_s12, %s903_s15  ;;  %p80_p0 = scmp.ne.s32.totalorder %s843_s11, %s839_s10 }
   0x7   : > { %p68_p1 = scmp.eq.s32.totalorder %s67_s17, 0  ;;  %p81_p2 = scmp.eq.s32.totalorder %s899_s13, 1 }
   0x8   : > { %p86_p3 = scmp.ne.s32.totalorder %s839_s10, %s835_s9  ;;  %p87_p4 = scmp.eq.s32.totalorder %s576_s14, 1 }
   0x9   : > { %s914_s18 = scalar_select %p68_p1, %s843_s11, %s70_s16  }
   0xa   : > { %p916_p5 = por %p81_p2, %p80_p0  ;;  %p920_p6 = por %p87_p4, %p86_p3 }
   0xb   : > { %p577_p7 = scmp.ge.s32.totalorder %s847_s12, 1  ;;  %p94_p8 = scmp.lt.s32.totalorder %s847_s12, 3 }
   0xc   : > { %s1102_s20 = scalar_select %p920_p6, 1, 0 }
   0xd   : > { %p697_p9 = scmp.eq.s32.totalorder %s899_s13, 0  ;;  %p927_p10 = pnand %p577_p7, %p94_p8 }
   0xe   : > { %s849_s22 = smov [#allocation2]  }
   0xf   : > { %s106_s23 = sshll.u32 %s849_s22, 4  ;;  %p689_p11 = pneg %p927_p10  ;;  %s107_s23 = int_to_ptr.vmem [resolvable:$true] %s106_s23 }
  0x10   : > { %s768_s24 = scalar_lea.vmem %s107_s23, 4096  ;;  %p776_p3 = scmp.lt.s32.totalorder %s107_s23, %s107_s23 }
  0x11   : > { %p690_p12 = pnand %p697_p9, %p689_p11  ;;  %p769_p0 = scmp.ne.s32.totalorder %s107_s23, %s768_s24 }
  0x12   : > { %p777_p4 = scmp.lt.s32.totalorder %s768_s24, %s768_s24 }
  0x13   : > { %p759_p13 = pneg %p690_p12 }
  0x14   : > { %p778_p6 = por %p777_p4, %p776_p3 }
  0x15   : > { %p771_p1 = pnand %p769_p0, %p759_p13 }
  0x17   : > { %p772_p2 = pneg %p771_p1 }
  0x19   : > { %p779_p7 = pnand %p778_p6, %p772_p2 }
  0x1b   : > { %782 = shalt.err (!%p779_p7)
}
  0x1c   : > { %s850_s25 = smov 128   ;;  %s851_s26 = smov 8  }
  0x1d   : > { %692 = dma.hbm_to_vmem [thread:$0]  (!%p690_p12), %s1099_s1, 4096, %s107_s23, [#allocation3], %s850_s25, %s850_s25, %s851_s26  }
  0x1e   : > { %131 = sbr.rel (%p927_p10) target bundleno = 671 (0x29f), region = 28 }
  0x23   : > { %826 = dma.done.wait (%p697_p9), [#allocation3], 4096  }
  0x24   : > { %828 = vsyncadd (%p697_p9), [#allocation3], 4294963200  ;;  %s583_s29 = sshll.u32 %s899_s13, 2  ;;  %s852_s6 = smov 126   ;;  %v854_v8 = vmov 3   ;;  %v398_v29 = vld [vmem:[#allocation2 + $0xf8] sm:$0xff] }
  0x25   : > { %p154_p8 = scmp.lt.s32.totalorder %s583_s29, 7  ;;  %s853_s7 = smov 127   ;;  %745 = vset.pattern.permute.xlu0 %v854_v8  ;;  %746 = vset.pattern.permute.xlu1 %v854_v8  ;;  %v382_v30 = vld [vmem:[#allocation2 + $0x78] sm:$0xff]  ;;  %v397_v31 = vld [vmem:[#allocation2 + $0xf0] sm:$0xff]  ;;  %v396_v33 = vld [vmem:[#allocation2 + $0xe8] sm:$0xff] }
  0x26   : > { %s855_s8 = smov 3   ;;  %607 = vmatprep.subr.mxu0 %v398_v29  ;;  %v381_v32 = vld [vmem:[#allocation2 + $0x70] sm:$0xff]  ;;  %651 = vmatprep.subr.mxu1 %v398_v29  ;;  %v380_v34 = vld [vmem:[#allocation2 + $0x68] sm:$0xff]  ;;  %v395_v35 = vld [vmem:[#allocation2 + $0xe0] sm:$0xff]  ;;  %s150_s14 = sand.u32 1, %s839_s10  }
  0x27   : > { %s1115_s29 = smov (!%p154_p8, %s583_s29), 7  ;;  %608 = vmatpush3.msra.mxu0 %v382_v30  ;;  %667 = vmatpush3.msra.mxu1 %v382_v30  ;;  %v379_v36 = vld [vmem:[#allocation2 + $0x60] sm:$0xff]  ;;  %v394_v41 = vld [vmem:[#allocation2 + $0xd8] sm:$0xff]  ;;  %v393_v43 = vld [vmem:[#allocation2 + $0xd0] sm:$0xff]  ;;  %s582_s16 = sshll.u32 %s150_s14, 5 }
  0x28   : > { %s584_s30 = sshll.u32 %s1115_s29, 3  ;;  %609 = vmatprep.subr.mxu0 %v397_v31  ;;  %652 = vmatprep.subr.mxu1 %v397_v31  ;;  %v378_v42 = vld [vmem:[#allocation2 + $0x58] sm:$0xff]  ;;  %v377_v44 = vld [vmem:[#allocation2 + $0x50] sm:$0xff]  ;;  %v392_v50 = vld [vmem:[#allocation2 + $0xc8] sm:$0xff]  ;;  %s152_s17 = scalar_lea.vmem [#allocation5], %s582_s16 }
  0x29   : > { %s157_s5 = scalar_lea.vmem %s1098_s0, %s584_s30  ;;  %610 = vmatpush3.msra.mxu0 %v381_v32  ;;  %668 = vmatpush3.msra.mxu1 %v381_v32  ;;  %v376_v51 = vld [vmem:[#allocation2 + $0x48] sm:$0xff]  ;;  %v391_v52 = vld [vmem:[#allocation2 + $0xc0] sm:$0xff]  ;;  %v390_v56 = vld [vmem:[#allocation2 + $0xb8] sm:$0xff]  ;;  %s502_s21 = sshll.u32 %s152_s17, 4  ;;  %s1051_s21 = int_to_ptr.vmem [resolvable:$true] %s502_s21 }
  0x2a   : > { %v948_v0 = vld [vmem:[%s157_s5] sm:$0xff]  ;;  %v950_v1 = vld [vmem:[%s157_s5 + $0x10] sm:$0xff]  ;;  %v954_v3 = vld [vmem:[%s157_s5 + $0x18] sm:$0xff]  ;;  %611 = vmatprep.subr.mxu0 %v396_v33  ;;  %653 = vmatprep.subr.mxu1 %v396_v33  ;;  %s606_s22 = sshll.u32 %s899_s13, 9  ;;  %s1058_s26 = scalar_lea.sflag [#allocation4], %s150_s14 }
  0x2b   : > { %187 = vrot.lane.b32.xlu1 %v948_v0, %s852_s6  ;;  %v171_v2 = vmul.u32 2, %v948_v0  ;;  %v173_v4 = vmul.u32 2, %v950_v1  ;;  %v957_v5 = vld [vmem:[%s157_s5 + $0x8] sm:$0xff]  ;;  %612 = vmatpush3.msra.mxu0 %v380_v34  ;;  %v203_v37 = vadd.s32 60, %v948_v0  ;;  %vm199_vm0 = vcmp.eq.s32.totalorder %v948_v0, 0  ;;  %v375_v55 = vld [vmem:[#allocation2 + $0x40] sm:$0xff]  ;;  %s1056_s25 = scalar_lea.hbm %s1100_s2, %s606_s22 }
  0x2c   : > { %v174_v6 = vmul.u32 2, %v954_v3  ;;  %v172_v7 = vmul.u32 2, %v957_v5  ;;  %669 = vmatpush3.msra.mxu1 %v380_v34  ;;  %613 = vmatprep.subr.mxu0 %v395_v35  ;;  %v205_v40 = vadd.s32 60, %v950_v1  ;;  %vm201_vm2 = vcmp.eq.s32.totalorder %v950_v1, 0  ;;  %v374_v61 = vld [vmem:[#allocation2 + $0x38] sm:$0xff]  ;;  %v371_v8 = vld [vmem:[#allocation2 + $0x20] sm:$0xff] }
  0x2d   : > { %175 = vrot.lane.b32.xlu0 %v171_v2, %s853_s7  ;;  %v167_v9 = vmul.u32 12, %v948_v0  ;;  %v169_v13 = vmul.u32 12, %v950_v1  ;;  %654 = vmatprep.subr.mxu1 %v395_v35  ;;  %v206_v49 = vadd.s32 60, %v954_v3  ;;  %vm202_vm5 = vcmp.eq.s32.totalorder %v954_v3, 0  ;;  %v389_v0 = vld [vmem:[#allocation2 + $0xb0] sm:$0xff]  ;;  %v388_v2 = vld [vmem:[#allocation2 + $0xa8] sm:$0xff] }
  0x2e   : > { %v170_v16 = vmul.u32 12, %v954_v3  ;;  %v168_v22 = vmul.u32 12, %v957_v5  ;;  %614 = vmatpush3.msra.mxu0 %v379_v36  ;;  %670 = vmatpush3.msra.mxu1 %v379_v36  ;;  %v204_v54 = vadd.s32 60, %v957_v5  ;;  %vm200_vm7 = vcmp.eq.s32.totalorder %v957_v5, 0  ;;  %s783_s27 = scalar_lea.vmem %s1051_s21, 512  ;;  %s860_s13 = smov [#allocation5]  }
  0x2f   : > { %191 = vrot.lane.b32.xlu1 %v950_v1, %s852_s6  ;;  %615 = vmatprep.subr.mxu0 %v394_v41  ;;  %v373_v1 = vld [vmem:[#allocation2 + $0x30] sm:$0xff]  ;;  %v160_v34 = vlaneseq  ;;  %p784_p6 = scmp.ne.s32.totalorder %s1051_s21, %s783_s27  ;;  %s787_s28 = sshll.u32 %s860_s13, 4  ;;  %s788_s28 = int_to_ptr.vmem [resolvable:$false] %s787_s28 }
  0x30   : > { %655 = vmatprep.subr.mxu1 %v394_v41  ;;  %616 = vmatpush3.msra.mxu0 %v378_v42  ;;  %s789_s29 = scalar_lea.vmem %s788_s28, 1024  ;;  %p790_p11 = scmp.lt.s32.totalorder %s1051_s21, %s788_s28 }
  0x31   : > { %179 = vrot.lane.b32.xlu0 %v173_v4, %s853_s7  ;;  %671 = vmatpush3.msra.mxu1 %v378_v42  ;;  %p785_p9 = pnand %p784_p6, %p916_p5  ;;  %p791_p12 = scmp.lt.s32.totalorder %s789_s29, %s783_s27 }
  0x32   : > { %617 = vmatprep.subr.mxu0 %v393_v43  ;;  %656 = vmatprep.subr.mxu1 %v393_v43 }
  0x33   : > { %181 = vrot.lane.b32.xlu1 %v174_v6, %s853_s7  ;;  %618 = vmatpush3.msra.mxu0 %v377_v44  ;;  %p786_p10 = pneg %p785_p9  ;;  %p792_p13 = por %p791_p12, %p790_p11 }
  0x34   : > { %672 = vmatpush3.msra.mxu1 %v377_v44  ;;  %619 = vmatprep.subr.mxu0 %v392_v50  ;;  %v859_v44 = vmov 1.0  }
  0x35   : > { %177 = vrot.lane.b32.xlu0 %v172_v7, %s853_s7  ;;  %620 = vmatpush3.msra.mxu0 %v376_v51  ;;  %v387_v7 = vld [vmem:[#allocation2 + $0xa0] sm:$0xff]  ;;  %p793_p0 = pnand %p792_p13, %p786_p10 }
  0x36   : > { %657 = vmatprep.subr.mxu1 %v392_v50  ;;  %621 = vmatprep.subr.mxu0 %v391_v52  ;;  %v1106_v50 = vmov 0 }
  0x37   : > { %193 = vrot.lane.b32.xlu1 %v954_v3, %s852_s6  ;;  %673 = vmatpush3.msra.mxu1 %v376_v51 }
  0x38   : > { %622 = vmatpush3.msra.mxu0 %v375_v55  ;;  %658 = vmatprep.subr.mxu1 %v391_v52 }
  0x39   : > { %189 = vrot.lane.b32.xlu0 %v957_v5, %s852_s6  ;;  %623 = vmatprep.subr.mxu0 %v390_v56  ;;  %v372_v5 = vld [vmem:[#allocation2 + $0x28] sm:$0xff] }
  0x3a   : > { %624 = vmatpush3.msra.mxu0 %v374_v61  ;;  %674 = vmatpush3.msra.mxu1 %v375_v55 }
  0x3b   : > { %625 = vmatprep.subr.mxu0 %v389_v0  ;;  %659 = vmatprep.subr.mxu1 %v390_v56 }
  0x3c   : > { %626 = vmatpush3.msra.mxu0 %v373_v1  ;;  %675 = vmatpush3.msra.mxu1 %v374_v61 }
  0x3d   : > { %627 = vmatprep.subr.mxu0 %v388_v2  ;;  %660 = vmatprep.subr.mxu1 %v389_v0 }
  0x3e   : > { %628 = vmatpush3.msra.mxu0 %v372_v5  ;;  %676 = vmatpush3.msra.mxu1 %v373_v1 }
  0x3f   : > { %629 = vmatprep.subr.mxu0 %v387_v7  ;;  %661 = vmatprep.subr.mxu1 %v388_v2 }
  0x40   : > { %630 = vmatpush3.msra.mxu0 %v371_v8  ;;  %677 = vmatpush3.msra.mxu1 %v372_v5 }
  0x41   : > { %662 = vmatprep.subr.mxu1 %v387_v7 }
  0x42   : > { %678 = vmatpush3.msra.mxu1 %v371_v8 }
  0x9d   : > { %v188_v10 = vpop.permute.xlu1 %187 }
  0x9f   : > { %v176_v11 = vpop.permute.xlu0 %175 }
  0xa0   : > { %v183_v12 = vadd.s32 %v176_v11, %v167_v9  ;;  %v856_v11 = vmov 7  }
  0xa1   : > { %v192_v14 = vpop.permute.xlu1 %191 }
  0xa2   : > { %v195_v15 = vadd.s32 %v188_v10, %v183_v12  ;;  %v386_v10 = vld [vmem:[#allocation2 + $0x98] sm:$0xff] }
  0xa3   : > { %v180_v17 = vpop.permute.xlu0 %179  ;;  %631 = vmatprep.subr.mxu0 %v386_v10  ;;  %v370_v12 = vld [vmem:[#allocation2 + $0x18] sm:$0xff]  ;;  %663 = vmatprep.subr.mxu1 %v386_v10 }
  0xa4   : > { %v185_v18 = vadd.s32 %v180_v17, %v169_v13  ;;  %207 = vrot.lane.b32.xlu0 %v195_v15, %s855_s8  ;;  %632 = vmatpush3.msra.mxu0 %v370_v12  ;;  %v369_v15 = vld [vmem:[#allocation2 + $0x10] sm:$0xff] }
  0xa5   : > { %v182_v19 = vpop.permute.xlu1 %181  ;;  %679 = vmatpush3.msra.mxu1 %v370_v12 }
  0xa6   : > { %v197_v20 = vadd.s32 %v192_v14, %v185_v18  ;;  %v186_v21 = vadd.s32 %v182_v19, %v170_v16  ;;  %v385_v14 = vld [vmem:[#allocation2 + $0x90] sm:$0xff]  ;;  %v384_v16 = vld [vmem:[#allocation2 + $0x88] sm:$0xff]  ;;  %v857_v19 = vmov 15  }
  0xa7   : > { %v178_v23 = vpop.permute.xlu0 %177  ;;  %633 = vmatprep.subr.mxu0 %v385_v14  ;;  %v368_v18 = vld [vmem:[#allocation2 + $0x8] sm:$0xff]  ;;  %664 = vmatprep.subr.mxu1 %v385_v14 }
  0xa8   : > { %211 = vrot.lane.b32.xlu1 %v197_v20, %s855_s8  ;;  %v184_v25 = vadd.s32 %v178_v23, %v168_v22  ;;  %634 = vmatpush3.msra.mxu0 %v369_v15  ;;  %v383_v20 = vld [vmem:[#allocation2 + $0x80] sm:$0xff]  ;;  %v858_v23 = vmov 11  }
  0xa9   : > { %v194_v24 = vpop.permute.xlu1 %193  ;;  %635 = vmatprep.subr.mxu0 %v384_v16  ;;  %v367_v22 = vld [vmem:[#allocation2] sm:$0xff]  ;;  %680 = vmatpush3.msra.mxu1 %v369_v15 }
  0xaa   : > { %v198_v26 = vadd.s32 %v194_v24, %v186_v21  ;;  %636 = vmatpush3.msra.mxu0 %v368_v18  ;;  %665 = vmatprep.subr.mxu1 %v384_v16 }
  0xab   : > { %v190_v27 = vpop.permute.xlu0 %189  ;;  %637 = vmatprep.subr.mxu0 %v383_v20  ;;  %681 = vmatpush3.msra.mxu1 %v368_v18 }
  0xac   : > { %v196_v28 = vadd.s32 %v190_v27, %v184_v25  ;;  %213 = vrot.lane.b32.xlu1 %v198_v26, %s855_s8  ;;  %638 = vmatpush3.msra.mxu0 %v367_v22 }
  0xad   : > { %666 = vmatprep.subr.mxu1 %v383_v20 }
  0xae   : > { %209 = vrot.lane.b32.xlu0 %v196_v28, %s855_s8  ;;  %682 = vmatpush3.msra.mxu1 %v367_v22 }
 0x116   : > { %v208_v38 = vpop.permute.xlu0 %207 }
 0x117   : > { %v215_v39 = vsel %vm199_vm0, %v208_v38, %v203_v37  ;;  %v1000_v37 = vand.u32 127, %v160_v34 }
 0x118   : > { %vm219_vm1 = vcmp.gt.s32.totalorder %v215_v39, 0 }
 0x119   : > { %v220_v45 = vsel %vm219_vm1, %v215_v39, 0 }
 0x11a   : > { %vm227_vm3 = vcmp.lt.s32.totalorder %v220_v45, 63  ;;  %v212_v46 = vpop.permute.xlu1 %211 }
 0x11b   : > { %v217_v47 = vsel %vm201_vm2, %v212_v46, %v205_v40  ;;  %v972_v48 = vsel %vm227_vm3, %v220_v45, 63  ;;  %v1003_v40 = vadd.s32 128, %v1000_v37 }
 0x11c   : > { %vm223_vm4 = vcmp.gt.s32.totalorder %v217_v47, 0  ;;  %236 = vperm.xlu0 %745, %v972_v48   ;;  %v255_v13 = vadd.s32 64, %v972_v48  ;;  %v319_v17 = vadd.s32 192, %v972_v48  ;;  %v287_v21 = vadd.s32 128, %v972_v48 }
 0x11d   : > { %v224_v53 = vsel %vm223_vm4, %v217_v47, 0 }
 0x11e   : > { %vm231_vm6 = vcmp.lt.s32.totalorder %v224_v53, 63  ;;  %v214_v57 = vpop.permute.xlu1 %213 }
 0x11f   : > { %v218_v58 = vsel %vm202_vm5, %v214_v57, %v206_v49  ;;  %v979_v59 = vsel %vm231_vm6, %v224_v53, 63 }
 0x120   : > { %vm225_vm8 = vcmp.gt.s32.totalorder %v218_v58, 0  ;;  %242 = vperm.xlu1 %746, %v979_v59   ;;  %v210_v60 = vpop.permute.xlu0 %209  ;;  %v257_v9 = vadd.s32 64, %v979_v59  ;;  %v289_v25 = vadd.s32 128, %v979_v59  ;;  %v321_v27 = vadd.s32 192, %v979_v59 }
 0x121   : > { %v226_v62 = vsel %vm225_vm8, %v218_v58, 0  ;;  %v216_v63 = vsel %vm200_vm7, %v210_v60, %v204_v54 }
 0x122   : > { %vm233_vm9 = vcmp.lt.s32.totalorder %v226_v62, 63  ;;  %vm221_vm10 = vcmp.gt.s32.totalorder %v216_v63, 0 }
 0x123   : > { %v222_v3 = vsel %vm221_vm10, %v216_v63, 0  ;;  %v982_v4 = vsel %vm233_vm9, %v226_v62, 63 }
 0x124   : > { %vm229_vm11 = vcmp.lt.s32.totalorder %v222_v3, 63  ;;  %245 = vperm.xlu0 %745, %v982_v4   ;;  %v322_v26 = vadd.s32 192, %v982_v4  ;;  %v258_v29 = vadd.s32 64, %v982_v4  ;;  %v290_v30 = vadd.s32 128, %v982_v4 }
 0x125   : > { %v985_v6 = vsel %vm229_vm11, %v222_v3, 63 }
 0x126   : > { %239 = vperm.xlu1 %746, %v985_v6   ;;  %v288_v24 = vadd.s32 128, %v985_v6  ;;  %v256_v28 = vadd.s32 64, %v985_v6  ;;  %v320_v31 = vadd.s32 192, %v985_v6 }
 0x128   : > { %748 = vset.pattern.permute.xlu0 %v856_v11 }
 0x129   : > { %266 = vperm.xlu0 %748, %v257_v9  }
 0x12a   : > { %747 = vset.pattern.permute.xlu1 %v856_v11 }
 0x12b   : > { %260 = vperm.xlu1 %747, %v255_v13  }
 0x12d   : > { %750 = vset.pattern.permute.xlu0 %v857_v19 }
 0x12e   : > { %324 = vperm.xlu0 %750, %v319_v17  }
 0x12f   : > { %749 = vset.pattern.permute.xlu1 %v858_v23 }
 0x130   : > { %292 = vperm.xlu1 %749, %v287_v21  }
 0x132   : > { %753 = vset.pattern.permute.xlu0 %v858_v23 }
 0x133   : > { %295 = vperm.xlu0 %753, %v288_v24  }
 0x134   : > { %298 = vperm.xlu1 %749, %v289_v25  }
 0x137   : > { %756 = vset.pattern.permute.xlu0 %v857_v19 }
 0x138   : > { %751 = vset.pattern.permute.xlu1 %v857_v19  ;;  %333 = vperm.xlu0 %756, %v322_v26  }
 0x139   : > { %330 = vperm.xlu1 %751, %v321_v27  }
 0x13d   : > { %752 = vset.pattern.permute.xlu1 %v856_v11 }
 0x13e   : > { %263 = vperm.xlu1 %752, %v256_v28  }
 0x142   : > { %269 = vperm.xlu1 %752, %v258_v29  }
 0x146   : > { %754 = vset.pattern.permute.xlu1 %v858_v23 }
 0x147   : > { %301 = vperm.xlu1 %754, %v290_v30  }
 0x14b   : > { %755 = vset.pattern.permute.xlu1 %v857_v19 }
 0x14c   : > { %327 = vperm.xlu1 %755, %v320_v31  }
 0x197   : > { %v237_v32 = vpop.permute.xlu0 %236 }
 0x198   : > { %vm247_vm14 = vcmp.eq.s32.totalorder %v1000_v37, %v237_v32  ;;  %vm248_vm15 = vcmp.eq.s32.totalorder %v1003_v40, %v237_v32 }
 0x19b   : > { %v243_v33 = vpop.permute.xlu1 %242 }
 0x19f   : > { %v246_v35 = vpop.permute.xlu0 %245 }
 0x1a1   : > { %v240_v36 = vpop.permute.xlu1 %239 }
 0x1a4   : > { %v267_v38 = vpop.permute.xlu0 %266 }
 0x1a5   : > { %vm275_vm7 = vcmp.eq.s32.totalorder %v1000_v37, %v267_v38  ;;  %vm276_vm10 = vcmp.eq.s32.totalorder %v1003_v40, %v267_v38 }
 0x1a6   : > { %v261_v39 = vpop.permute.xlu1 %260 }
 0x1a7   : > { %vm271_vm12 = vcmp.eq.s32.totalorder %v1000_v37, %v261_v39  ;;  %vm272_vm13 = vcmp.eq.s32.totalorder %v1003_v40, %v261_v39 }
 0x1a8   : > { %vm279_vm0 = vmor %vm247_vm14, %vm271_vm12  ;;  %vm251_vm12 = vcmp.eq.s32.totalorder %v1000_v37, %v243_v33 }
 0x1a9   : > { %v325_v41 = vpop.permute.xlu0 %324  ;;  %vm280_vm3 = vmor %vm248_vm15, %vm272_vm13  ;;  %vm252_vm13 = vcmp.eq.s32.totalorder %v1003_v40, %v243_v33 }
 0x1aa   : > { %vm336_vm6 = vcmp.eq.s32.totalorder %v1003_v40, %v325_v41  ;;  %vm335_vm8 = vcmp.eq.s32.totalorder %v1000_v37, %v325_v41  ;;  %vm283_vm15 = vmor %vm251_vm12, %vm275_vm7  ;;  %vm249_vm7 = vcmp.eq.s32.totalorder %v1000_v37, %v240_v36  ;;  %vm250_vm12 = vcmp.eq.s32.totalorder %v1003_v40, %v240_v36 }
 0x1ab   : > { %v293_v42 = vpop.permute.xlu1 %292 }
 0x1ac   : > { %vm303_vm1 = vcmp.eq.s32.totalorder %v1000_v37, %v293_v42  ;;  %vm304_vm2 = vcmp.eq.s32.totalorder %v1003_v40, %v293_v42 }
 0x1ad   : > { %vm311_vm4 = vmor %vm279_vm0, %vm303_vm1 }
 0x1ae   : > { %vm312_vm5 = vmor %vm280_vm3, %vm304_vm2  ;;  %v296_v47 = vpop.permute.xlu0 %295 }
 0x1af   : > { %v299_v43 = vpop.permute.xlu1 %298  ;;  %vm344_vm9 = vmor %vm312_vm5, %vm336_vm6 }
 0x1b0   : > { %593 = vmatprep.mubr.msk.f32.mxu0 %vm344_vm9, %v859_v44  ;;  %vm343_vm11 = vmor %vm311_vm4, %vm335_vm8  ;;  %vm307_vm14 = vcmp.eq.s32.totalorder %v1000_v37, %v299_v43  ;;  %vm308_vm0 = vcmp.eq.s32.totalorder %v1003_v40, %v299_v43 }
 0x1b1   : > { %594 = vmatmul.mubr.msk.f32.vlgmr.msra.gmra.mxu0 %vm343_vm11, %v859_v44  ;;  %vm284_vm1 = vmor %vm252_vm13, %vm276_vm10  ;;  %vm305_vm13 = vcmp.eq.s32.totalorder %v1000_v37, %v296_v47 }
 0x1b2   : > { %vm315_vm2 = vmor %vm283_vm15, %vm307_vm14 }
 0x1b3   : > { %vm316_vm5 = vmor %vm284_vm1, %vm308_vm0  ;;  %vm253_vm1 = vcmp.eq.s32.totalorder %v1000_v37, %v246_v35  ;;  %v334_v51 = vpop.permute.xlu0 %333 }
 0x1b4   : > { %v331_v45 = vpop.permute.xlu1 %330 }
 0x1b5   : > { %vm339_vm3 = vcmp.eq.s32.totalorder %v1000_v37, %v331_v45  ;;  %vm340_vm6 = vcmp.eq.s32.totalorder %v1003_v40, %v331_v45 }
 0x1b6   : > { %vm347_vm9 = vmor %vm315_vm2, %vm339_vm3  ;;  %vm254_vm3 = vcmp.eq.s32.totalorder %v1003_v40, %v246_v35 }
 0x1b7   : > { %vm348_vm4 = vmor %vm316_vm5, %vm340_vm6 }
 0x1b8   : > { %597 = vmatprep.mubr.msk.f32.mxu1 %vm348_vm4, %v859_v44 }
 0x1b9   : > { %598 = vmatmul.mubr.msk.f32.vlgmr.msra.gmra.mxu1 %vm347_vm9, %v859_v44  ;;  %v264_v46 = vpop.permute.xlu1 %263 }
 0x1ba   : > { %vm273_vm8 = vcmp.eq.s32.totalorder %v1000_v37, %v264_v46  ;;  %vm274_vm11 = vcmp.eq.s32.totalorder %v1003_v40, %v264_v46 }
 0x1bb   : > { %vm281_vm10 = vmor %vm249_vm7, %vm273_vm8  ;;  %vm342_vm7 = vcmp.eq.s32.totalorder %v1003_v40, %v334_v51 }
 0x1bc   : > { %vm1027_vm15 = vmor %vm250_vm12, %vm274_vm11 }
 0x1bd   : > { %v270_v48 = vpop.permute.xlu1 %269  ;;  %vm1033_vm2 = vmor %vm281_vm10, %vm305_vm13  ;;  %vm341_vm10 = vcmp.eq.s32.totalorder %v1000_v37, %v334_v51  ;;  %vm306_vm13 = vcmp.eq.s32.totalorder %v1003_v40, %v296_v47 }
 0x1be   : > { %vm277_vm14 = vcmp.eq.s32.totalorder %v1000_v37, %v270_v48  ;;  %vm278_vm0 = vcmp.eq.s32.totalorder %v1003_v40, %v270_v48  ;;  %v1107_v50 = vsel %vm1033_vm2, 4294967295, %v1106_v50 }
 0x1bf   : > { %vm285_vm5 = vmor %vm253_vm1, %vm277_vm14 }
 0x1c0   : > { %vm286_vm6 = vmor %vm254_vm3, %vm278_vm0  ;;  %vm1108_vm3 = vnez %v1107_v50 }
 0x1c1   : > { %vm314_vm14 = vmor %vm1027_vm15, %vm306_vm13 }
 0x1c2   : > { %v302_v52 = vpop.permute.xlu1 %301 }
 0x1c3   : > { %vm309_vm9 = vcmp.eq.s32.totalorder %v1000_v37, %v302_v52  ;;  %vm310_vm4 = vcmp.eq.s32.totalorder %v1003_v40, %v302_v52 }
 0x1c4   : > { %vm317_vm8 = vmor %vm285_vm5, %vm309_vm9 }
 0x1c5   : > { %vm318_vm11 = vmor %vm286_vm6, %vm310_vm4 }
 0x1c6   : > { %vm350_vm12 = vmor %vm318_vm11, %vm342_vm7 }
 0x1c7   : > { %599 = vmatprep.mubr.msk.f32.mxu1 %vm350_vm12, %v859_v44  ;;  %v328_v53 = vpop.permute.xlu1 %327  ;;  %vm349_vm2 = vmor %vm317_vm8, %vm341_vm10 }
 0x1c8   : > { %vm337_vm0 = vcmp.eq.s32.totalorder %v1000_v37, %v328_v53  ;;  %vm338_vm1 = vcmp.eq.s32.totalorder %v1003_v40, %v328_v53  ;;  %600 = vmatmul.mubr.msk.f32.gmra.mxu1 %vm349_vm2, %v859_v44 }
 0x1c9   : > { %vm345_vm5 = vmor %vm1108_vm3, %vm337_vm0 }
 0x1ca   : > { %vm346_vm6 = vmor %vm314_vm14, %vm338_vm1 }
 0x1cb   : > { %595 = vmatprep.mubr.msk.f32.mxu0 %vm346_vm6, %v859_v44 }
 0x1cc   : > { %596 = vmatmul.mubr.msk.f32.gmra.mxu0 %vm345_vm5, %v859_v44 }
 0x271   : > { %v639_v54 = vpop.f32.mrf.mxu0 }
 0x273   : > { %v640_v55 = vpop.f32.mrf.mxu0 }
 0x274   : > { %v641_v56 = vadd.f32 %v640_v55, %v639_v54 }
 0x276   : > { %484 = vst [vmem:[%s152_s17] sm:$0xff] %v641_v56 }
 0x279   : > { %v645_v57 = vpop.f32.mrf.mxu1 }
 0x27b   : > { %v646_v58 = vpop.f32.mrf.mxu1 }
 0x27c   : > { %v647_v59 = vadd.f32 %v646_v58, %v645_v57 }
 0x27e   : > { %486 = vst [vmem:[%s152_s17 + $0x10] sm:$0xff] %v647_v59 }
 0x288   : > { %v648_v60 = vpop.f32.mrf.mxu1 }
 0x28a   : > { %v649_v61 = vpop.f32.mrf.mxu1 }
 0x28b   : > { %v650_v62 = vadd.f32 %v649_v61, %v648_v60 }
 0x28c   : > { %v642_v63 = vpop.f32.mrf.mxu0 }
 0x28d   : > { %487 = vst [vmem:[%s152_s17 + $0x18] sm:$0xff] %v650_v62 }
 0x28e   : > { %v643_v0 = vpop.f32.mrf.mxu0 }
 0x28f   : > { %v644_v1 = vadd.f32 %v643_v0, %v642_v63 }
 0x291   : > { %485 = vst [vmem:[%s152_s17 + $0x8] sm:$0xff] %v644_v1 }
 0x292   : > { %796 = shalt.err (!%p793_p0)
}
 0x293   : > { %s797_s30 = scalar_lea.hbm %s1056_s25, 512  ;;  %s801_s5 = scalar_lea.hbm %s1100_s2, 1024 }
 0x294   : > { %p798_p1 = scmp.ne.s32.totalorder %s1056_s25, %s797_s30  ;;  %p802_p4 = scmp.lt.s32.totalorder %s1056_s25, %s1100_s2 }
 0x295   : > { %p803_p7 = scmp.lt.s32.totalorder %s801_s5, %s797_s30 }
 0x296   : > { %p799_p2 = pnand %p798_p1, %p916_p5 }
 0x297   : > { %p804_p8 = por %p803_p7, %p802_p4 }
 0x298   : > { %p800_p3 = pneg %p799_p2 }
 0x29a   : > { %p805_p6 = pnand %p804_p8, %p800_p3 }
 0x29c   : > { %808 = shalt.err (!%p805_p6)
}
 0x29d   : > { %s861_s8 = smov 128   ;;  %s862_s14 = smov 8  }
 0x29e   : > { %687 = dma.vmem_to_hbm [thread:$0]  (%p916_p5), %s1051_s21, 512, %s1056_s25, %s1058_s26, %s861_s8, %s861_s8, %s862_s14  }
 0x29f PF: > { %p699_p9 = scmp.ge.s32.totalorder %s847_s12, 2  ;;  %s517_s16 = sand.u32 1, %s835_s9  }
 0x2a0   : > { %p1109_p10 = scmp.ne.s32.totalorder %s1102_s20, 0  ;;  %s518_s17 = scalar_lea.sflag [#allocation4], %s517_s16 }
 0x2a2   : > { %p694_p11 = pnand %p699_p9, %p1109_p10 }
 0x2a4   : > { %p695_p12 = pneg %p694_p11 }
 0x2a6   : > { %830 = dma.done.wait (%p695_p12), %s518_s17, 512  }
 0x2a7   : > { %832 = vsyncadd (%p695_p12), %s518_s17, 4294966784  ;;  %p13_p13 = scmp.ge.s32.totalorder %s903_s15, 4   ;;  %s1110_s9 = smov %s839_s10 }
 0x2a8   : > { %s1111_s10 = smov %s843_s11  ;;  %s1112_s11 = smov %s914_s18 }
 0x2a9   : > { %s1113_s12 = smov %s903_s15  ;;  %15 = sbr.rel (!%p13_p13) target bundleno = 4 (0x4), region = 68 }
 0x2ae   :  { %523 = vsyncpa [#allocation3], 1 }
 0x2af   :  { %525 = vsyncpa [#allocation3 + $0x1], 1 }
 0x2b0   :  { %526 = vsyncpa [#allocation4], 1 }
 0x2b1   :  { %528 = vsyncpa [#allocation4 + $0x1], 1 }

</bundles_post_ra>
